<compile_context>
chip_gen: v7x
topology: tpu7x:2x2x1
jax: 0.10.0
libtpu: 0.0.40
codegen_flags: <defaults>
</compile_context>

<pallas_src>
import math
from functools import partial

import numpy as np
import jax
import jax.numpy as jnp
from jax.experimental import pallas as pl
from jax.experimental.pallas import tpu as pltpu

LOG_STD_MAX = 2.0
LOG_STD_MIN = -20.0
_HALF_LOG_2PI = 0.5 * math.log(2.0 * math.pi)


def _round_up(x, m):
    return -(-x // m) * m


def _actor_kernel(num_hidden, k, act_dim, act_limit, ka_pad, *refs):
    # refs = [obs,
    #         wt_0..wt_{H-1}, b_0..b_{H-1},
    #         w_head, b_head, expand, sel, sel_t, grp,
    #         onehot, eps,
    #         pi_out, logp_out]
    ka = k * act_dim
    obs_ref = refs[0]
    wt_refs = refs[1:1 + num_hidden]
    b_refs = refs[1 + num_hidden:1 + 2 * num_hidden]
    (w_head_ref, b_head_ref, expand_ref, sel_ref, sel_t_ref, grp_ref,
     onehot_ref, eps_ref, pi_ref, logp_ref) = refs[1 + 2 * num_hidden:]

    # ---- MLP trunk (ReLU after every layer, including the last) ----
    h = obs_ref[...]                                            # (TN, obs_dim) f32
    for li in range(num_hidden):
        w = wt_refs[li][...]                                    # (in, out) bf16/f32
        acc = jnp.dot(h.astype(w.dtype), w, preferred_element_type=jnp.float32)
        h = jnp.maximum(acc + b_refs[li][...], 0.0)             # f32

    # ---- fused mu / log_std head; segments start on 128-lane boundaries ----
    w_head = w_head_ref[...]                                    # (H_last, 2*ka_pad)
    heads = jnp.dot(h.astype(w_head.dtype), w_head,
                    preferred_element_type=jnp.float32) + b_head_ref[...]
    mu_full = heads[:, :ka]                                     # (TN, kA), aligned slice
    ls_full = jnp.clip(heads[:, ka_pad:ka_pad + ka], LOG_STD_MIN, LOG_STD_MAX)

    # ---- per-sample component selection (tiny MXU matmuls, no lane shuffles) ----
    onehot_exp = jnp.dot(onehot_ref[...], expand_ref[...],
                         preferred_element_type=jnp.float32)    # (TN, kA)
    sel = sel_ref[...]                                          # (kA, A)
    mu_s = jnp.dot(mu_full * onehot_exp, sel, preferred_element_type=jnp.float32)
    ls_s = jnp.dot(ls_full * onehot_exp, sel, preferred_element_type=jnp.float32)
    std_s = jnp.exp(ls_s)                                       # only A exps per row

    # Normal(mu, std).rsample()
    pi = mu_s + std_s * eps_ref[...]                            # (TN, A)

    # tanh-squash correction: sum_a 2*(log2 - pi - softplus(-2 pi)); j-independent,
    # so it is factored out of the logsumexp (identical math to the reference).
    corr = jnp.sum(2.0 * (math.log(2.0) - pi - jnp.logaddexp(0.0, -2.0 * pi)),
                   axis=-1, keepdims=True)                      # (TN, 1)

    # per-component Gaussian log-prob on the full (TN, kA) slab
    pi_tiled = jnp.dot(pi, sel_t_ref[...], preferred_element_type=jnp.float32)  # (TN, kA)
    inv_std_full = jnp.exp(-ls_full)                            # EUP; replaces divides
    z = (pi_tiled - mu_full) * inv_std_full
    contrib = -0.5 * z * z - ls_full                            # (TN, kA)
    lp = jnp.dot(contrib, grp_ref[...], preferred_element_type=jnp.float32) \
        - float(act_dim) * _HALF_LOG_2PI                        # (TN, k)

    # logsumexp over components
    m = jnp.max(lp, axis=-1, keepdims=True)
    lse = m + jnp.log(jnp.sum(jnp.exp(lp - m), axis=-1, keepdims=True))
    logp = lse - corr - math.log(float(k))                      # (TN, 1)

    pi_ref[...] = act_limit * jnp.tanh(pi)                      # (TN, A)
    logp_ref[...] = logp                                        # (TN, 1)


def squashed_gmm_actor_forward(obs, params, onehot, eps, *, k, act_dim, act_limit,
                               tile_n=1024, weight_dtype=jnp.bfloat16):
    n, obs_dim = obs.shape
    ka = k * act_dim
    ka_pad = _round_up(ka, 128)

    # ---- host-side parameter packing (constant per step) ----
    wts = [jnp.asarray(w).T.astype(weight_dtype) for (w, b) in params["hidden"]]  # (in, out)
    biases = [jnp.asarray(b).reshape(1, -1).astype(jnp.float32)
              for (w, b) in params["hidden"]]

    def pad_cols(x, width):
        x = jnp.asarray(x, jnp.float32)
        return jnp.pad(x, ((0, 0), (0, width - x.shape[1]))) if x.shape[1] < width else x

    # fused head: [mu block padded to ka_pad | log_std block padded to ka_pad]
    w_head = jnp.concatenate(
        [pad_cols(jnp.asarray(params["w_mu"]).T, ka_pad),
         pad_cols(jnp.asarray(params["w_ls"]).T, ka_pad)], axis=1).astype(weight_dtype)
    b_head = jnp.concatenate(
        [pad_cols(jnp.asarray(params["b_mu"]).reshape(1, -1), ka_pad),
         pad_cols(jnp.asarray(params["b_ls"]).reshape(1, -1), ka_pad)],
        axis=1).astype(jnp.float32)                              # (1, 2*ka_pad)

    # constant expansion / selection / grouping matrices (all resident, tiny)
    eyeA = np.eye(act_dim, dtype=np.float32)
    expand_mat = jnp.asarray(np.repeat(np.eye(k, dtype=np.float32), act_dim, axis=1))  # (k, kA)
    sel_mat = jnp.asarray(np.tile(eyeA, (k, 1)))                 # (kA, A)
    sel_t_mat = jnp.asarray(np.tile(eyeA, (1, k)))               # (A, kA)
    grp_mat = jnp.asarray(np.repeat(np.eye(k, dtype=np.float32), act_dim, axis=0))     # (kA, k)

    # ---- batch tiling: keep >=2 grid steps when possible (v7x 2-TC sharding) ----
    n8 = _round_up(n, 8)
    tn = min(tile_n, n8)
    if tn >= n8 and n8 >= 16:
        tn = -(-n8 // 2)
    tn = _round_up(tn, 8)
    n_pad = _round_up(n, tn)

    def pad_batch(x):
        return jnp.pad(x, ((0, n_pad - n), (0, 0))) if n_pad > n else x

    obs_p = pad_batch(jnp.asarray(obs, jnp.float32))
    onehot_p = pad_batch(jnp.asarray(onehot, jnp.float32))       # raw (n, k) one-hot
    eps_p = pad_batch(jnp.asarray(eps, jnp.float32))

    batched = lambda w: pl.BlockSpec((tn, w), lambda i: (i, 0))
    resident = lambda shp: pl.BlockSpec(tuple(int(s) for s in shp), lambda i: (0, 0),
                                        pipeline_mode=pl.Buffered(1))

    in_specs = [batched(obs_dim)]
    in_specs += [resident(w.shape) for w in wts]
    in_specs += [resident(b.shape) for b in biases]
    in_specs += [resident(w_head.shape), resident(b_head.shape),
                 resident(expand_mat.shape), resident(sel_mat.shape),
                 resident(sel_t_mat.shape), resident(grp_mat.shape),
                 batched(k), batched(act_dim)]
    out_specs = [batched(act_dim), batched(1)]
    out_shape = (jax.ShapeDtypeStruct((n_pad, act_dim), jnp.float32),
                 jax.ShapeDtypeStruct((n_pad, 1), jnp.float32))

    kernel = partial(_actor_kernel, len(wts), k, act_dim, float(act_limit), ka_pad)

    # ---- VMEM budget (resident weights single-buffered + 2x batched tiles + slabs) ----
    res_bytes = int(sum(int(w.size) * w.dtype.itemsize for w in wts)
                    + sum(int(b.size) * 4 for b in biases)
                    + int(w_head.size) * w_head.dtype.itemsize + int(b_head.size) * 4
                    + 4 * (int(expand_mat.size) + int(sel_mat.size)
                           + int(sel_t_mat.size) + int(grp_mat.size)))
    stream_bytes = 2 * 4 * tn * (obs_dim + k + 2 * act_dim + 1)
    widest = max([int(w.shape[1]) for w in wts] + [2 * ka_pad, obs_dim])
    interm_bytes = 8 * 4 * tn * widest
    vmem_limit = int(min(60 * 2**20,
                         max(16 * 2**20,
                             (res_bytes + stream_bytes + interm_bytes) * 3 // 2)))

    # advisory cost estimate for the XLA scheduler
    mm_cols = (sum(int(w.shape[0]) * int(w.shape[1]) for w in wts)
               + int(w_head.shape[0]) * int(w_head.shape[1])
               + k * ka + 2 * ka * act_dim + act_dim * ka + ka * k)
    flops = int(2 * n_pad * mm_cols)
    transcendentals = int(n_pad * (ka + 4 * act_dim + k + 4))
    bytes_accessed = int(4 * n_pad * (obs_dim + k + 2 * act_dim + 1) + res_bytes)

    pi_pad, logp_pad = pl.pallas_call(
        kernel,
        out_shape=out_shape,
        grid=(n_pad // tn,),
        in_specs=in_specs,
        out_specs=out_specs,
        compiler_params=pltpu.CompilerParams(
            dimension_semantics=("parallel",),
            vmem_limit_bytes=vmem_limit),
        cost_estimate=pl.CostEstimate(flops=flops,
                                      transcendentals=transcendentals,
                                      bytes_accessed=bytes_accessed),
    )(obs_p, *wts, *biases, w_head, b_head,
      expand_mat, sel_mat, sel_t_mat, grp_mat, onehot_p, eps_p)

    return pi_pad[:n], logp_pad[:n, 0]


def init_params(key, obs_dim, hidden_sizes, act_dim, k):
    """Deterministic PyTorch-Linear-style init (uniform +-1/sqrt(fan_in))."""
    def linear(kk, fan_in, fan_out):
        kw, kb = jax.random.split(kk)
        bound = 1.0 / math.sqrt(fan_in)
        w = jax.random.uniform(kw, (fan_out, fan_in), jnp.float32, -bound, bound)
        b = jax.random.uniform(kb, (fan_out,), jnp.float32, -bound, bound)
        return w, b

    sizes = [obs_dim] + list(hidden_sizes)
    keys = jax.random.split(key, len(sizes) - 1 + 2)
    params = {"hidden": []}
    for i in range(len(sizes) - 1):
        params["hidden"].append(linear(keys[i], sizes[i], sizes[i + 1]))
    params["w_mu"], params["b_mu"] = linear(keys[-2], sizes[-1], k * act_dim)
    params["w_ls"], params["b_ls"] = linear(keys[-1], sizes[-1], k * act_dim)
    return params


def reference_forward(obs, params, onehot, eps, *, k, act_dim, act_limit):
    """Pure-JAX (f32) mirror of the PyTorch forward (stochastic, with_logprob=True)."""
    h = obs
    for (w, b) in params["hidden"]:
        h = jax.nn.relu(h @ w.T + b)
    mu = h @ params["w_mu"].T + params["b_mu"]
    log_std = jnp.clip(h @ params["w_ls"].T + params["b_ls"], LOG_STD_MIN, LOG_STD_MAX)
    std = jnp.exp(log_std)
    n = mu.shape[0]
    mu = jnp.transpose(mu.reshape(n, k, act_dim), (1, 0, 2))      # (k, n, A)
    std = jnp.transpose(std.reshape(n, k, act_dim), (1, 0, 2))
    comps = jnp.argmax(onehot, axis=-1)
    mu_s = mu[comps, jnp.arange(n), :]
    std_s = std[comps, jnp.arange(n), :]
    pi = mu_s + std_s * eps
    corr = jnp.sum(2.0 * (jnp.log(2.0) - pi - jax.nn.softplus(-2.0 * pi)), axis=-1)
    logp_k = []
    for j in range(k):
        z = (pi - mu[j]) / std[j]
        lp = jnp.sum(-0.5 * z * z - jnp.log(std[j]) - _HALF_LOG_2PI, axis=-1)
        logp_k.append(lp - corr)
    logp_k = jnp.stack(logp_k, axis=1)                            # (n, k)
    logp = jax.scipy.special.logsumexp(logp_k, axis=1) - jnp.log(float(k))
    return act_limit * jnp.tanh(pi), logp


if __name__ == "__main__":
    obs_dim, act_dim = 16, 4
    hidden_sizes = (32, 32)
    k = 4
    act_limit = 1.0

    key = jax.random.PRNGKey(0)
    k_param, k_obs, k_comp, k_eps = jax.random.split(key, 4)
    params = init_params(k_param, obs_dim, hidden_sizes, act_dim, k)

    # --- test 1: bf16 trunk (default), grid auto-split into 2 steps (v7x 2-TC path) ---
    n = 16
    obs = jax.random.normal(k_obs, (n, obs_dim), jnp.float32)
    comps = jax.random.randint(k_comp, (n,), 0, k)
    onehot = jax.nn.one_hot(comps, k, dtype=jnp.float32)
    eps = jax.random.normal(k_eps, (n, act_dim), jnp.float32)

    pi, logp = squashed_gmm_actor_forward(
        obs, params, onehot, eps, k=k, act_dim=act_dim, act_limit=act_limit)
    jax.block_until_ready((pi, logp))

    pi_ref, logp_ref = reference_forward(
        obs, params, onehot, eps, k=k, act_dim=act_dim, act_limit=act_limit)
    np.testing.assert_allclose(np.asarray(pi), np.asarray(pi_ref), rtol=2e-2, atol=2e-2)
    np.testing.assert_allclose(np.asarray(logp), np.asarray(logp_ref), rtol=2e-2, atol=2e-2)

    # --- test 2: f32 weights, batch not a multiple of the tile -> padding + 3-step grid ---
    n2 = 20
    k_obs2, k_comp2, k_eps2 = jax.random.split(jax.random.PRNGKey(1), 3)
    obs2 = jax.random.normal(k_obs2, (n2, obs_dim), jnp.float32)
    comps2 = jax.random.randint(k_comp2, (n2,), 0, k)
    onehot2 = jax.nn.one_hot(comps2, k, dtype=jnp.float32)
    eps2 = jax.random.normal(k_eps2, (n2, act_dim), jnp.float32)

    pi2, logp2 = squashed_gmm_actor_forward(
        obs2, params, onehot2, eps2, k=k, act_dim=act_dim, act_limit=act_limit,
        tile_n=8, weight_dtype=jnp.float32)
    jax.block_until_ready((pi2, logp2))

    pi2_ref, logp2_ref = reference_forward(
        obs2, params, onehot2, eps2, k=k, act_dim=act_dim, act_limit=act_limit)
    np.testing.assert_allclose(np.asarray(pi2), np.asarray(pi2_ref), rtol=1e-2, atol=1e-2)
    np.testing.assert_allclose(np.asarray(logp2), np.asarray(logp2_ref), rtol=1e-2, atol=1e-2)

    print("KERNEL_OK")
</pallas_src>

<mosaic_0001>
module attributes {stable_mosaic.version = 11 : i64} {
  func.func @_actor_kernel(%arg0: i32, %arg1: memref<8x16xf32, #tpu.memory_space<vmem>>, %arg2: memref<16x32xbf16, #tpu.memory_space<vmem>>, %arg3: memref<32x32xbf16, #tpu.memory_space<vmem>>, %arg4: memref<1x32xf32, #tpu.memory_space<vmem>>, %arg5: memref<1x32xf32, #tpu.memory_space<vmem>>, %arg6: memref<32x256xbf16, #tpu.memory_space<vmem>>, %arg7: memref<1x256xf32, #tpu.memory_space<vmem>>, %arg8: memref<4x16xf32, #tpu.memory_space<vmem>>, %arg9: memref<16x4xf32, #tpu.memory_space<vmem>>, %arg10: memref<4x16xf32, #tpu.memory_space<vmem>>, %arg11: memref<16x4xf32, #tpu.memory_space<vmem>>, %arg12: memref<8x4xf32, #tpu.memory_space<vmem>>, %arg13: memref<8x4xf32, #tpu.memory_space<vmem>>, %arg14: memref<8x4xf32, #tpu.memory_space<vmem>>, %arg15: memref<8x1xf32, #tpu.memory_space<vmem>>) attributes {dimension_semantics = [#tpu.dimension_semantics<parallel>], iteration_bounds = array<i64: 2>, scalar_prefetch = 0 : i64, scratch_operands = 0 : i64, tpu.core_type = #tpu.core_type<tc>, window_params = [{transform_indices = @transform_0, window_bounds = array<i64: 8, 16>}, {pipeline_mode = #tpu.pipeline_mode<synchronous>, transform_indices = @transform_1, window_bounds = array<i64: 16, 32>}, {pipeline_mode = #tpu.pipeline_mode<synchronous>, transform_indices = @transform_2, window_bounds = array<i64: 32, 32>}, {pipeline_mode = #tpu.pipeline_mode<synchronous>, transform_indices = @transform_3, window_bounds = array<i64: 1, 32>}, {pipeline_mode = #tpu.pipeline_mode<synchronous>, transform_indices = @transform_4, window_bounds = array<i64: 1, 32>}, {pipeline_mode = #tpu.pipeline_mode<synchronous>, transform_indices = @transform_5, window_bounds = array<i64: 32, 256>}, {pipeline_mode = #tpu.pipeline_mode<synchronous>, transform_indices = @transform_6, window_bounds = array<i64: 1, 256>}, {pipeline_mode = #tpu.pipeline_mode<synchronous>, transform_indices = @transform_7, window_bounds = array<i64: 4, 16>}, {pipeline_mode = #tpu.pipeline_mode<synchronous>, transform_indices = @transform_8, window_bounds = array<i64: 16, 4>}, {pipeline_mode = #tpu.pipeline_mode<synchronous>, transform_indices = @transform_9, window_bounds = array<i64: 4, 16>}, {pipeline_mode = #tpu.pipeline_mode<synchronous>, transform_indices = @transform_10, window_bounds = array<i64: 16, 4>}, {transform_indices = @transform_11, window_bounds = array<i64: 8, 4>}, {transform_indices = @transform_12, window_bounds = array<i64: 8, 4>}, {transform_indices = @transform_13, window_bounds = array<i64: 8, 4>}, {transform_indices = @transform_14, window_bounds = array<i64: 8, 1>}]} {
    %c0 = arith.constant 0 : index
    %c0_0 = arith.constant 0 : index
    %0 = vector.load %arg1[%c0, %c0_0] : memref<8x16xf32, #tpu.memory_space<vmem>>, vector<8x16xf32>
    %c0_1 = arith.constant 0 : index
    %c0_2 = arith.constant 0 : index
    %1 = vector.load %arg2[%c0_1, %c0_2] : memref<16x32xbf16, #tpu.memory_space<vmem>>, vector<16x32xbf16>
    %2 = arith.truncf %0 : vector<8x16xf32> to vector<8x16xbf16>
    %cst = arith.constant dense<0.000000e+00> : vector<8x32xf32>
    %3 = tpu.matmul %2, %1, %cst {dimension_numbers = #tpu.dot_dimension_numbers<[1], [0], [0], [1], [0, 0, 1, 1], [], []>} : vector<8x16xbf16>, vector<16x32xbf16>, vector<8x32xf32> -> vector<8x32xf32>
    %c0_3 = arith.constant 0 : index
    %c0_4 = arith.constant 0 : index
    %4 = vector.load %arg4[%c0_3, %c0_4] : memref<1x32xf32, #tpu.memory_space<vmem>>, vector<1x32xf32>
    %5 = vector.broadcast %4 : vector<1x32xf32> to vector<8x32xf32>
    %6 = arith.addf %3, %5 : vector<8x32xf32>
    %cst_5 = arith.constant 0.000000e+00 : f32
    %7 = vector.broadcast %cst_5 : f32 to vector<8x32xf32>
    %8 = arith.maximumf %6, %7 : vector<8x32xf32>
    %c0_6 = arith.constant 0 : index
    %c0_7 = arith.constant 0 : index
    %9 = vector.load %arg3[%c0_6, %c0_7] : memref<32x32xbf16, #tpu.memory_space<vmem>>, vector<32x32xbf16>
    %10 = arith.truncf %8 : vector<8x32xf32> to vector<8x32xbf16>
    %cst_8 = arith.constant dense<0.000000e+00> : vector<8x32xf32>
    %11 = tpu.matmul %10, %9, %cst_8 {dimension_numbers = #tpu.dot_dimension_numbers<[1], [0], [0], [1], [0, 0, 1, 1], [], []>} : vector<8x32xbf16>, vector<32x32xbf16>, vector<8x32xf32> -> vector<8x32xf32>
    %c0_9 = arith.constant 0 : index
    %c0_10 = arith.constant 0 : index
    %12 = vector.load %arg5[%c0_9, %c0_10] : memref<1x32xf32, #tpu.memory_space<vmem>>, vector<1x32xf32>
    %13 = vector.broadcast %12 : vector<1x32xf32> to vector<8x32xf32>
    %14 = arith.addf %11, %13 : vector<8x32xf32>
    %cst_11 = arith.constant 0.000000e+00 : f32
    %15 = vector.broadcast %cst_11 : f32 to vector<8x32xf32>
    %16 = arith.maximumf %14, %15 : vector<8x32xf32>
    %c0_12 = arith.constant 0 : index
    %c0_13 = arith.constant 0 : index
    %17 = vector.load %arg6[%c0_12, %c0_13] : memref<32x256xbf16, #tpu.memory_space<vmem>>, vector<32x256xbf16>
    %18 = arith.truncf %16 : vector<8x32xf32> to vector<8x32xbf16>
    %cst_14 = arith.constant dense<0.000000e+00> : vector<8x256xf32>
    %19 = tpu.matmul %18, %17, %cst_14 {dimension_numbers = #tpu.dot_dimension_numbers<[1], [0], [0], [1], [0, 0, 1, 1], [], []>} : vector<8x32xbf16>, vector<32x256xbf16>, vector<8x256xf32> -> vector<8x256xf32>
    %c0_15 = arith.constant 0 : index
    %c0_16 = arith.constant 0 : index
    %20 = vector.load %arg7[%c0_15, %c0_16] : memref<1x256xf32, #tpu.memory_space<vmem>>, vector<1x256xf32>
    %21 = vector.broadcast %20 : vector<1x256xf32> to vector<8x256xf32>
    %22 = arith.addf %19, %21 : vector<8x256xf32>
    %23 = vector.extract_strided_slice %22 {offsets = [0, 0], sizes = [8, 16], strides = [1, 1]} : vector<8x256xf32> to vector<8x16xf32>
    %24 = vector.extract_strided_slice %22 {offsets = [0, 128], sizes = [8, 16], strides = [1, 1]} : vector<8x256xf32> to vector<8x16xf32>
    %cst_17 = arith.constant -2.000000e+01 : f32
    %cst_18 = arith.constant 2.000000e+00 : f32
    %25 = vector.broadcast %cst_17 : f32 to vector<8x16xf32>
    %26 = arith.maximumf %25, %24 : vector<8x16xf32>
    %27 = vector.broadcast %cst_18 : f32 to vector<8x16xf32>
    %28 = arith.minimumf %27, %26 : vector<8x16xf32>
    %c0_19 = arith.constant 0 : index
    %c0_20 = arith.constant 0 : index
    %29 = vector.load %arg12[%c0_19, %c0_20] : memref<8x4xf32, #tpu.memory_space<vmem>>, vector<8x4xf32>
    %c0_21 = arith.constant 0 : index
    %c0_22 = arith.constant 0 : index
    %30 = vector.load %arg8[%c0_21, %c0_22] : memref<4x16xf32, #tpu.memory_space<vmem>>, vector<4x16xf32>
    %cst_23 = arith.constant dense<0.000000e+00> : vector<8x16xf32>
    %31 = tpu.matmul %29, %30, %cst_23 {dimension_numbers = #tpu.dot_dimension_numbers<[1], [0], [0], [1], [0, 0, 1, 1], [], []>} : vector<8x4xf32>, vector<4x16xf32>, vector<8x16xf32> -> vector<8x16xf32>
    %c0_24 = arith.constant 0 : index
    %c0_25 = arith.constant 0 : index
    %32 = vector.load %arg9[%c0_24, %c0_25] : memref<16x4xf32, #tpu.memory_space<vmem>>, vector<16x4xf32>
    %33 = arith.mulf %23, %31 : vector<8x16xf32>
    %cst_26 = arith.constant dense<0.000000e+00> : vector<8x4xf32>
    %34 = tpu.matmul %33, %32, %cst_26 {dimension_numbers = #tpu.dot_dimension_numbers<[1], [0], [0], [1], [0, 0, 1, 1], [], []>} : vector<8x16xf32>, vector<16x4xf32>, vector<8x4xf32> -> vector<8x4xf32>
    %35 = arith.mulf %28, %31 : vector<8x16xf32>
    %cst_27 = arith.constant dense<0.000000e+00> : vector<8x4xf32>
    %36 = tpu.matmul %35, %32, %cst_27 {dimension_numbers = #tpu.dot_dimension_numbers<[1], [0], [0], [1], [0, 0, 1, 1], [], []>} : vector<8x16xf32>, vector<16x4xf32>, vector<8x4xf32> -> vector<8x4xf32>
    %37 = math.exp %36 : vector<8x4xf32>
    %c0_28 = arith.constant 0 : index
    %c0_29 = arith.constant 0 : index
    %38 = vector.load %arg13[%c0_28, %c0_29] : memref<8x4xf32, #tpu.memory_space<vmem>>, vector<8x4xf32>
    %39 = arith.mulf %37, %38 : vector<8x4xf32>
    %40 = arith.addf %34, %39 : vector<8x4xf32>
    %cst_30 = arith.constant 0.693147182 : f32
    %41 = vector.broadcast %cst_30 : f32 to vector<8x4xf32>
    %42 = arith.subf %41, %40 : vector<8x4xf32>
    %cst_31 = arith.constant -2.000000e+00 : f32
    %43 = vector.broadcast %cst_31 : f32 to vector<8x4xf32>
    %44 = arith.mulf %43, %40 : vector<8x4xf32>
    %cst_32 = arith.constant 0.000000e+00 : f32
    %45 = vector.broadcast %cst_32 : f32 to vector<8x4xf32>
    %46 = arith.maximumf %45, %44 : vector<8x4xf32>
    %47 = vector.broadcast %cst_32 : f32 to vector<8x4xf32>
    %48 = arith.subf %47, %44 : vector<8x4xf32>
    %49 = arith.cmpf one, %48, %48 : vector<8x4xf32>
    %50 = vector.broadcast %cst_32 : f32 to vector<8x4xf32>
    %51 = arith.addf %50, %44 : vector<8x4xf32>
    %52 = math.absf %48 : vector<8x4xf32>
    %cst_33 = arith.constant 0.000000e+00 : f32
    %53 = vector.broadcast %cst_33 : f32 to vector<8x4xf32>
    %54 = arith.subf %53, %52 : vector<8x4xf32>
    %55 = math.exp %54 : vector<8x4xf32>
    %56 = math.log1p %55 : vector<8x4xf32>
    %57 = arith.addf %46, %56 : vector<8x4xf32>
    %58 = arith.select %49, %51, %57 : vector<8x4xi1>, vector<8x4xf32>
    %59 = arith.subf %42, %58 : vector<8x4xf32>
    %cst_34 = arith.constant 2.000000e+00 : f32
    %60 = vector.broadcast %cst_34 : f32 to vector<8x4xf32>
    %61 = arith.mulf %60, %59 : vector<8x4xf32>
    %cst_35 = arith.constant dense<0.000000e+00> : vector<8xf32>
    %62 = vector.multi_reduction <add>, %61, %cst_35 [1] : vector<8x4xf32> to vector<8xf32>
    %63 = vector.shape_cast %62 : vector<8xf32> to vector<8x1xf32>
    %c0_36 = arith.constant 0 : index
    %c0_37 = arith.constant 0 : index
    %64 = vector.load %arg10[%c0_36, %c0_37] : memref<4x16xf32, #tpu.memory_space<vmem>>, vector<4x16xf32>
    %cst_38 = arith.constant dense<0.000000e+00> : vector<8x16xf32>
    %65 = tpu.matmul %40, %64, %cst_38 {dimension_numbers = #tpu.dot_dimension_numbers<[1], [0], [0], [1], [0, 0, 1, 1], [], []>} : vector<8x4xf32>, vector<4x16xf32>, vector<8x16xf32> -> vector<8x16xf32>
    %cst_39 = arith.constant 0.000000e+00 : f32
    %66 = vector.broadcast %cst_39 : f32 to vector<8x16xf32>
    %67 = arith.subf %66, %28 : vector<8x16xf32>
    %68 = math.exp %67 : vector<8x16xf32>
    %69 = arith.subf %65, %23 : vector<8x16xf32>
    %70 = arith.mulf %69, %68 : vector<8x16xf32>
    %cst_40 = arith.constant -5.000000e-01 : f32
    %71 = vector.broadcast %cst_40 : f32 to vector<8x16xf32>
    %72 = arith.mulf %71, %70 : vector<8x16xf32>
    %73 = arith.mulf %72, %70 : vector<8x16xf32>
    %74 = arith.subf %73, %28 : vector<8x16xf32>
    %c0_41 = arith.constant 0 : index
    %c0_42 = arith.constant 0 : index
    %75 = vector.load %arg11[%c0_41, %c0_42] : memref<16x4xf32, #tpu.memory_space<vmem>>, vector<16x4xf32>
    %cst_43 = arith.constant dense<0.000000e+00> : vector<8x4xf32>
    %76 = tpu.matmul %74, %75, %cst_43 {dimension_numbers = #tpu.dot_dimension_numbers<[1], [0], [0], [1], [0, 0, 1, 1], [], []>} : vector<8x16xf32>, vector<16x4xf32>, vector<8x4xf32> -> vector<8x4xf32>
    %cst_44 = arith.constant 3.67575407 : f32
    %77 = vector.broadcast %cst_44 : f32 to vector<8x4xf32>
    %78 = arith.subf %76, %77 : vector<8x4xf32>
    %cst_45 = arith.constant dense<0xFF800000> : vector<8xf32>
    %79 = vector.multi_reduction <maximumf>, %78, %cst_45 [1] : vector<8x4xf32> to vector<8xf32>
    %80 = vector.shape_cast %79 : vector<8xf32> to vector<8x1xf32>
    %81 = vector.broadcast %80 : vector<8x1xf32> to vector<8x4xf32>
    %82 = arith.subf %78, %81 : vector<8x4xf32>
    %83 = math.exp %82 : vector<8x4xf32>
    %cst_46 = arith.constant dense<0.000000e+00> : vector<8xf32>
    %84 = vector.multi_reduction <add>, %83, %cst_46 [1] : vector<8x4xf32> to vector<8xf32>
    %85 = vector.shape_cast %84 : vector<8xf32> to vector<8x1xf32>
    %86 = math.log %85 : vector<8x1xf32>
    %87 = arith.addf %80, %86 : vector<8x1xf32>
    %88 = arith.subf %87, %63 : vector<8x1xf32>
    %cst_47 = arith.constant 1.38629436 : f32
    %89 = vector.broadcast %cst_47 : f32 to vector<8x1xf32>
    %90 = arith.subf %88, %89 : vector<8x1xf32>
    %91 = math.tanh %40 : vector<8x4xf32>
    %cst_48 = arith.constant 1.000000e+00 : f32
    %92 = vector.broadcast %cst_48 : f32 to vector<8x4xf32>
    %93 = arith.mulf %92, %91 : vector<8x4xf32>
    %c0_49 = arith.constant 0 : index
    %c0_50 = arith.constant 0 : index
    %94 = vector.load %arg14[%c0_49, %c0_50] : memref<8x4xf32, #tpu.memory_space<vmem>>, vector<8x4xf32>
    tpu.vector_store %arg14[%c0_49, %c0_50], %93 {strides = array<i32>} : memref<8x4xf32, #tpu.memory_space<vmem>>, vector<8x4xf32>,
    %c0_51 = arith.constant 0 : index
    %c0_52 = arith.constant 0 : index
    %95 = vector.load %arg15[%c0_51, %c0_52] : memref<8x1xf32, #tpu.memory_space<vmem>>, vector<8x1xf32>
    tpu.vector_store %arg15[%c0_51, %c0_52], %90 {strides = array<i32>} : memref<8x1xf32, #tpu.memory_space<vmem>>, vector<8x1xf32>,
    return
  }
  func.func @transform_0(%arg0: i32) -> (i32, i32) {
    %c0_i32 = arith.constant 0 : i32
    %c0_i32_0 = arith.constant 0 : i32
    return %arg0, %c0_i32 : i32, i32
  }
  func.func @transform_1(%arg0: i32) -> (i32, i32) {
    %c0_i32 = arith.constant 0 : i32
    %c0_i32_0 = arith.constant 0 : i32
    %c0_i32_1 = arith.constant 0 : i32
    return %c0_i32, %c0_i32_0 : i32, i32
  }
  func.func @transform_2(%arg0: i32) -> (i32, i32) {
    %c0_i32 = arith.constant 0 : i32
    %c0_i32_0 = arith.constant 0 : i32
    %c0_i32_1 = arith.constant 0 : i32
    return %c0_i32, %c0_i32_0 : i32, i32
  }
  func.func @transform_3(%arg0: i32) -> (i32, i32) {
    %c0_i32 = arith.constant 0 : i32
    %c0_i32_0 = arith.constant 0 : i32
    %c0_i32_1 = arith.constant 0 : i32
    return %c0_i32, %c0_i32_0 : i32, i32
  }
  func.func @transform_4(%arg0: i32) -> (i32, i32) {
    %c0_i32 = arith.constant 0 : i32
    %c0_i32_0 = arith.constant 0 : i32
    %c0_i32_1 = arith.constant 0 : i32
    return %c0_i32, %c0_i32_0 : i32, i32
  }
  func.func @transform_5(%arg0: i32) -> (i32, i32) {
    %c0_i32 = arith.constant 0 : i32
    %c0_i32_0 = arith.constant 0 : i32
    %c0_i32_1 = arith.constant 0 : i32
    return %c0_i32, %c0_i32_0 : i32, i32
  }
  func.func @transform_6(%arg0: i32) -> (i32, i32) {
    %c0_i32 = arith.constant 0 : i32
    %c0_i32_0 = arith.constant 0 : i32
    %c0_i32_1 = arith.constant 0 : i32
    return %c0_i32, %c0_i32_0 : i32, i32
  }
  func.func @transform_7(%arg0: i32) -> (i32, i32) {
    %c0_i32 = arith.constant 0 : i32
    %c0_i32_0 = arith.constant 0 : i32
    %c0_i32_1 = arith.constant 0 : i32
    return %c0_i32, %c0_i32_0 : i32, i32
  }
  func.func @transform_8(%arg0: i32) -> (i32, i32) {
    %c0_i32 = arith.constant 0 : i32
    %c0_i32_0 = arith.constant 0 : i32
    %c0_i32_1 = arith.constant 0 : i32
    return %c0_i32, %c0_i32_0 : i32, i32
  }
  func.func @transform_9(%arg0: i32) -> (i32, i32) {
    %c0_i32 = arith.constant 0 : i32
    %c0_i32_0 = arith.constant 0 : i32
    %c0_i32_1 = arith.constant 0 : i32
    return %c0_i32, %c0_i32_0 : i32, i32
  }
  func.func @transform_10(%arg0: i32) -> (i32, i32) {
    %c0_i32 = arith.constant 0 : i32
    %c0_i32_0 = arith.constant 0 : i32
    %c0_i32_1 = arith.constant 0 : i32
    return %c0_i32, %c0_i32_0 : i32, i32
  }
  func.func @transform_11(%arg0: i32) -> (i32, i32) {
    %c0_i32 = arith.constant 0 : i32
    %c0_i32_0 = arith.constant 0 : i32
    return %arg0, %c0_i32 : i32, i32
  }
  func.func @transform_12(%arg0: i32) -> (i32, i32) {
    %c0_i32 = arith.constant 0 : i32
    %c0_i32_0 = arith.constant 0 : i32
    return %arg0, %c0_i32 : i32, i32
  }
  func.func @transform_13(%arg0: i32) -> (i32, i32) {
    %c0_i32 = arith.constant 0 : i32
    %c0_i32_0 = arith.constant 0 : i32
    return %arg0, %c0_i32 : i32, i32
  }
  func.func @transform_14(%arg0: i32) -> (i32, i32) {
    %c0_i32 = arith.constant 0 : i32
    %c0_i32_0 = arith.constant 0 : i32
    return %arg0, %c0_i32 : i32, i32
  }
}

</mosaic_0001>

<bundles_post_ra>
// kernel: tpu_custom_call.1
= control target key start
LH: loop header
LB: loop body
LE: loop exit
PB: predicated region body
PF: predicated region fallthrough
CT: control target
= control target key end

     0   :  { %20 = vsyncpa [#allocation3], 0  ;;  %s1830_s0 = inlined_call_operand.vmem [shape: f32[16,16], index: 0, kind: input, shape index: {}]   ;;  %s1831_s1 = inlined_call_operand.vmem [shape: bf16[16,32], index: 1, kind: input, shape index: {}]   ;;  %s1832_s2 = inlined_call_operand.vmem [shape: bf16[32,32], index: 2, kind: input, shape index: {}]   ;;  %s1833_s3 = inlined_call_operand.hbm [shape: f32[1,32], index: 3, kind: input, shape index: {}]   ;;  %s1834_s4 = inlined_call_operand.hbm [shape: f32[1,32], index: 4, kind: input, shape index: {}]   ;;  %s1835_s5 = inlined_call_operand.vmem [shape: bf16[32,256], index: 5, kind: input, shape index: {}]   ;;  %s1836_s6 = inlined_call_operand.vmem [shape: f32[1,256], index: 6, kind: input, shape index: {}]   ;;  %s1837_s7 = inlined_call_operand.vmem [shape: f32[4,16], index: 7, kind: input, shape index: {}]   ;;  %s1838_s8 = inlined_call_operand.vmem [shape: f32[16,4], index: 8, kind: input, shape index: {}]   ;;  %s1839_s9 = inlined_call_operand.vmem [shape: f32[4,16], index: 9, kind: input, shape index: {}]   ;;  %s1840_s10 = inlined_call_operand.vmem [shape: f32[16,4], index: 10, kind: input, shape index: {}]   ;;  %s1841_s11 = inlined_call_operand.vmem [shape: f32[16,4], index: 11, kind: input, shape index: {}]   ;;  %s1842_s12 = inlined_call_operand.vmem [shape: f32[16,4], index: 12, kind: input, shape index: {}]   ;;  %s1843_s13 = inlined_call_operand.vmem [shape: f32[16,4], index: 13, kind: output, shape index: {0}]   ;;  %s1844_s14 = inlined_call_operand.vmem [shape: f32[16,1], index: 14, kind: output, shape index: {1}]  }
   0x1   :  { %21 = vsyncpa [#allocation5], 0  ;;  %s1636_s29 = smov 0  }
   0x2 LB: > { %s1642_s30 = sadd.s32 4294967295, %s1553_s29   ;;  %p1320_p0 = scmp.ge.s32.totalorder %s1553_s29, 1  ;;  %s1553_s29 = sphi %s1636_s29, %s27_s29  }
   0x3   : > { %p372_p1 = scmp.lt.s32.totalorder %s1553_s29, 3  ;;  %p1845_p2 = scmp.eq.s32.totalorder %s1642_s30, 0 }
   0x4   : > { %s1555_s16 = smov [#allocation2]   ;;  %s1556_s18 = smov [#allocation4]  }
   0x5   : > { %p1647_p3 = pnand %p1320_p0, %p372_p1  ;;  %s391_s17 = sshll.u32 %s1555_s16, 4  ;;  %s392_s17 = int_to_ptr.vmem [resolvable:$true] %s391_s17 }
   0x6   : > { %s402_s19 = sshll.u32 %s1556_s18, 4  ;;  %s1483_s23 = scalar_lea.hbm %s1833_s3, 16  ;;  %s1659_s19 = int_to_ptr.vmem [resolvable:$true] %s402_s19 }
   0x7   : > { %s1847_s15 = scalar_select %p1647_p3, 1, 0 }
   0x8   : > { %p1435_p4 = pneg %p1647_p3  ;;  %p1484_p6 = scmp.ne.s32.totalorder %s1833_s3, %s1483_s23 }
   0x9   : > { %p1490_p10 = scmp.lt.u32.totalorder %s1483_s23, %s1833_s3 }
   0xa   : > { %p1655_p5 = pnand %p1845_p2, %p1435_p4 }
   0xc   : > { %p1485_p7 = pneg %p1655_p5 }
   0xe   : > { %p1486_p8 = pnand %p1485_p7, %p1484_p6 }
  0x10   : > { %p1487_p9 = pneg %p1486_p8 }
  0x12   : > { %p1492_p11 = pnand %p1490_p10, %p1487_p9 }
  0x14   : > { %1495 = shalt.err (!%p1492_p11)
}
  0x15   : > { %s1496_s28 = scalar_lea.vmem %s392_s17, 16  ;;  %s1503_s16 = scalar_lea.vmem %s392_s17, 32 }
  0x16   : > { %p1497_p12 = scmp.ne.s32.totalorder %s392_s17, %s1496_s28  ;;  %p1504_p1 = scmp.lt.s32.totalorder %s392_s17, %s392_s17 }
  0x17   : > { %p1505_p4 = scmp.lt.s32.totalorder %s1503_s16, %s1496_s28 }
  0x18   : > { %p1499_p13 = pnand %p1497_p12, %p1485_p7 }
  0x19   : > { %p1506_p2 = por %p1505_p4, %p1504_p1 }
  0x1a   : > { %p1500_p0 = pneg %p1499_p13 }
  0x1c   : > { %p1507_p3 = pnand %p1506_p2, %p1500_p0 }
  0x1e   : > { %1510 = shalt.err (!%p1507_p3)
}
  0x1f   : > { %1438 = dma.hbm_to_vmem [thread:$0]  (!%p1655_p5), %s1833_s3, 16, %s392_s17, [#allocation3]  }
  0x20   : > { %s1511_s24 = scalar_lea.hbm %s1834_s4, 16 }
  0x21   : > { %p1512_p6 = scmp.ne.s32.totalorder %s1834_s4, %s1511_s24  ;;  %p1518_p3 = scmp.lt.u32.totalorder %s1511_s24, %s1834_s4 }
  0x23   : > { %p1514_p8 = pnand %p1512_p6, %p1485_p7 }
  0x25   : > { %p1515_p2 = pneg %p1514_p8 }
  0x27   : > { %p1520_p9 = pnand %p1518_p3, %p1515_p2 }
  0x29   : > { %1523 = shalt.err (!%p1520_p9)
}
  0x2a   : > { %s1524_s17 = scalar_lea.vmem %s1659_s19, 16  ;;  %s1531_s16 = scalar_lea.vmem %s1659_s19, 32 }
  0x2b   : > { %p1525_p10 = scmp.ne.s32.totalorder %s1659_s19, %s1524_s17  ;;  %p1532_p13 = scmp.lt.s32.totalorder %s1659_s19, %s1659_s19 }
  0x2c   : > { %p1533_p0 = scmp.lt.s32.totalorder %s1531_s16, %s1524_s17 }
  0x2d   : > { %p1527_p11 = pnand %p1525_p10, %p1485_p7 }
  0x2e   : > { %p1534_p1 = por %p1533_p0, %p1532_p13 }
  0x2f   : > { %p1528_p12 = pneg %p1527_p11 }
  0x31   : > { %p1535_p4 = pnand %p1534_p1, %p1528_p12 }
  0x33   : > { %1538 = shalt.err (!%p1535_p4)
}
  0x34   : > { %1441 = dma.hbm_to_vmem [thread:$0]  (!%p1655_p5), %s1834_s4, 16, %s1659_s19, [#allocation5]  }
  0x35   : > { %p1849_p6 = scmp.ne.s32.totalorder %s1847_s15, 0 }
  0x36   : > { %p1850_p7 = scmp.eq.s32.totalorder (!%p1849_p6), %s1642_s30, 0 }
  0x37   : > { %454 = sbr.rel (%p1849_p6) target bundleno = 1717 (0x6b5), region = 72 }
  0x3e   : > { %1544 = dma.done.wait (%p1850_p7), [#allocation3], 16   ;;  %p1851_p8 = pmov %p1850_p7 }
  0x3f   : > { %p1852_p2 = pmov %p1850_p7 }
  0x40   : > { %1546 = vsyncadd (%p1851_p8), [#allocation3], 4294967280 }
  0x41   : > { %1548 = dma.done.wait (%p1852_p2), [#allocation5], 16   ;;  %p1853_p3 = pmov %p1852_p2 }
  0x42   : > { %p514_p9 = scmp.lt.s32.totalorder %s1642_s30, 1  ;;  %v1557_v0 = vmov 0.0   ;;  %vm1558_vm0 = vmmov 0   ;;  %v1460_v1 = vld [vmem:[%s1831_s1] sm:$0xff]   ;;  %vm552_vm1 = vcmask 130048   ;;  %v1462_v5 = vld [vmem:[%s1832_s2 + $0x8] sm:$0xff]   ;;  %v673_v35 = vlaneseq }
  0x43   : > { %1550 = vsyncadd (%p1853_p3), [#allocation5], 4294967280  ;;  %1373 = vmatprep.subr.bf16.mxu0 %v1557_v0  ;;  %1375 = vmatprep.mubr.msk.bf16.mxu0 %vm1558_vm0, %v1557_v0  ;;  %v1461_v4 = vld [vmem:[%s1832_s2] sm:$0xff]   ;;  %vm621_vm2 = vcmask 261120   ;;  %v1468_v16 = vld [vmem:[%s1835_s5 + $0x14] ss:$8 sps:$4 sm:$0xff]  }
  0x44   : > { %s1855_s30 = smov (!%p514_p9, %s1642_s30), 1  ;;  %1379 = vmatprep.subr.bf16.mxu1 %v1557_v0  ;;  %1383 = vmatprep.mubr.msk.bf16.mxu1 %vm1558_vm0, %v1557_v0  ;;  %v1463_v6 = vld [vmem:[%s1835_s5] ss:$8 sps:$4 sm:$0xff]   ;;  %v1465_v7 = vld [vmem:[%s1835_s5 + $0x4] ss:$8 sps:$4 sm:$0xff]   ;;  %vm755_vm3 = vcmask 1043456  }
  0x45   : > { %s1727_s15 = sshll.u32 %s1855_s30, 3  ;;  %1374 = vmatpush3.bf16.msra.mxu0 %v1460_v1  ;;  %1380 = vmatpush3.bf16.msra.mxu1 %v1461_v4  ;;  %v1332_v8 = vld [vmem:[#allocation2] ss:$0 sm:$0xff]  ;;  %v1466_v17 = vld [vmem:[%s1835_s5 + $0x10] ss:$8 sps:$4 sm:$0xff]   ;;  %v1559_v19 = vmov 0  }
  0x46   : > { %s517_s22 = scalar_lea.vmem %s1830_s0, %s1727_s15  ;;  %1381 = vmatprep.subr.bf16.mxu1 %v1557_v0  ;;  %706 = vmatprep.subr.bf16.mxu0 %v1465_v7  ;;  %v750_v18 = vld [vmem:[%s1837_s7] sm:$0xf]  ;;  %s521_s30 = scalar_lea.vmem %s1841_s11, %s1727_s15  ;;  %vm751_vm4 = vcmask 31744   ;;  %v830_v30 = vld [vmem:[%s1838_s8 + $0x8] sm:$0xff]  ;;  %v1560_v32 = vmov 0.0|0.0   ;;  %v674_v36 = vshrl.u32 %v673_v35, 7 }
  0x47   : > { %v535_v2 = vld [vmem:[%s517_s22] sm:$0xff]  ;;  %s525_s24 = scalar_lea.vmem %s1842_s12, %s1727_s15  ;;  %s533_s19 = scalar_lea.vmem %s1844_s14, %s1727_s15  ;;  %vm1186_vm7 = vcmask 7168  }
  0x48   : > { %v538_v3 = vpack.c.bf16 %v535_v2, %v535_v2  ;;  %v749_v20 = vld [vmem:[%s521_s30] sm:$0xff]  ;;  %v675_v37 = vsub.s32 0, %v674_v36  ;;  %v679_v39 = vsub.s32 1, %v674_v36  ;;  %s529_s30 = scalar_lea.vmem %s1843_s13, %s1727_s15 }
  0x49   : > { %1382 = vmatpush3.bf16.msra.mxu1 %v1462_v5  ;;  %v1335_v21 = vld [vmem:[#allocation4] ss:$0 sm:$0xff]  ;;  %v671_v38 = vld [vmem:[%s1836_s6] sm:$0x3] }
  0x4a   : > { %1376 = vmatmul.mubr.msk.bf16.vlgmr.msra.gmra.mrb[0].mxu0 %vm552_vm1, %v538_v3  ;;  %1387 = vmatprep.subr.mxu1 %v1557_v0  ;;  %v829_v29 = vld [vmem:[%s1838_s8] sm:$0xff]  ;;  %v676_v40 = vrot.slane %v671_v38, %v675_v37  ;;  %v680_v41 = vrot.slane %v671_v38, %v679_v39 }
  0x4b   : > { %707 = vmatpush1.bf16.msra.mxu0 %v1463_v6  ;;  %738 = vmatprep.mubr.bf16.mxu0 %v1559_v19  ;;  %v1419_v31 = vpack.c.bf16 %v830_v30, %v829_v29  ;;  %v1009_v52 = vld [vmem:[%s1839_s9] sm:$0xf] }
  0x4c   : > { %708 = vmatprep.subr.bf16.mxu0 %v1468_v16  ;;  %v908_v58 = vld [vmem:[%s525_s24] sm:$0xff] }
  0x4f   : > { %709 = vmatpush1.bf16.msra.mxu0 %v1466_v17 }
  0x50   : > { %1418 = vmatprep.subr.bf16.mxu0 %v1560_v32 }
 0x11d   : > { %v590_v9 = vpop.f32.mrb[0].mxu0 }
 0x11e   : > { %v591_v10 = vadd.f32 %v1332_v8, %v590_v9  ;;  %v1377_v11 = vpop.f32.mrb[1].mxu0 }
 0x11f   : > { %v593_v12 = vpop.f32.mrb[2].mxu0 }
 0x120   : > { %v596_v13 = vmax.f32 %v591_v10, 0.0  ;;  %v1378_v14 = vpop.f32.mrb[3].mxu0 }
 0x122   : > { %v601_v15 = vpack.c.bf16 %v596_v13, %v596_v13 }
 0x124   : > { %1384 = vmatmul.mubr.msk.bf16.vlgmr.msra.gmra.mrb[0].mxu1 %vm621_vm2, %v601_v15 }
 0x125   : > { %1389 = vmatprep.mubr.msk.f32.mxu1 %vm1558_vm0, %v1557_v0  ;;  %1388 = vmatpush3.msk.msra.mxu1 %vm755_vm3, %v750_v18 }
 0x126   : > { %1421 = vmatprep.subr.bf16.mxu1 %v1560_v32 }
 0x12c   : > { %1390 = vmatmul.mubr.msk.f32.vlgmr.msra.gmra.mrb[4].mxu1 %vm751_vm4, %v749_v20  ;;  %v1094_v20 = vld [vmem:[%s1840_s10] sm:$0xff] }
 0x12d   : > { %1403 = vmatprep.mubr.msk.f32.mxu1 %vm1558_vm0, %v1557_v0  ;;  %1423 = vmatpush3.bf16.msra.mxu1 %v1419_v31 }
 0x12e   : > { %1424 = vmatprep.subr.bf16.mxu1 %v1560_v32 }
 0x1f7   : > { %v659_v22 = vpop.f32.mrb[0].mxu1 }
 0x1f8   : > { %v660_v23 = vadd.f32 %v1335_v21, %v659_v22  ;;  %v1385_v24 = vpop.f32.mrb[1].mxu1  ;;  %v1095_v21 = vld [vmem:[%s1840_s10 + $0x8] sm:$0xff] }
 0x1f9   : > { %v662_v25 = vpop.f32.mrb[2].mxu1  ;;  %v1425_v22 = vpack.c.bf16 %v1095_v21, %v1094_v20 }
 0x1fa   : > { %v665_v26 = vmax.f32 %v660_v23, 0.0  ;;  %v1386_v27 = vpop.f32.mrb[3].mxu1 }
 0x1fc   : > { %v670_v28 = vpack.c.bf16 %v665_v26, %v665_v26 }
 0x1fe   : > { %1343 = vmatmul.mubr.msk.bf16.vlgmr.msra.gmra.mrb[4].mxu0 %vm621_vm2, %v670_v28 }
 0x1ff   : > { %1396 = vmatprep.mubr.msk.f32.mxu0 %vm1558_vm0, %v1557_v0  ;;  %v825_v33 = vpop.f32.mrb[4].mxu1  ;;  %1420 = vmatpush3.bf16.msra.mxu0 %v1419_v31 }
 0x200   : > { %v1391_v34 = vpop.f32.mrb[5].mxu1  ;;  %1406 = vmatprep.subr.mxu0 %v1557_v0 }
 0x2d1   : > { %v740_v42 = vpop.f32.mrb[4].mxu0 }
 0x2d2   : > { %v1784_v43 = vadd.f32 %v740_v42, %v676_v40  ;;  %v742_v44 = vpop.f32.mrb[5].mxu0 }
 0x2d3   : > { %v743_v45 = vadd.f32 %v742_v44, %v680_v41  ;;  %v744_v46 = vpop.f32.mrb[6].mxu0 }
 0x2d4   : > { %v831_v47 = vmul.f32 %v825_v33, %v1784_v43  ;;  %v745_v48 = vpop.f32.mrb[7].mxu0 }
 0x2d5   : > { %v747_v49 = vmax.f32 %v743_v45, -20.0 }
 0x2d6   : > { %1404 = vmatmul.mubr.msk.f32.vlgmr.msra.gmra.mrb[6].mxu1 %vm552_vm1, %v831_v47 }
 0x2d7   : > { %v1788_v50 = vmin.f32 %v747_v49, 2.0  ;;  %1415 = vmatprep.mubr.msk.f32.mxu1 %vm1558_vm0, %v1557_v0  ;;  %1426 = vmatpush3.bf16.msra.mxu1 %v1425_v22 }
 0x2d9   : > { %v832_v51 = vmul.f32 %v825_v33, %v1788_v50  ;;  %v1086_v23 = vsub.f32 0.0, %v1788_v50 }
 0x2db   : > { %1397 = vmatmul.mubr.msk.f32.vlgmr.msra.gmra.mrb[8].mxu0 %vm552_vm1, %v832_v51  ;;  %v1087_v24 = vmul.f32 1.442695, %v1086_v23 }
 0x2dc   : > { %1408 = vmatprep.mubr.msk.f32.mxu0 %vm1558_vm0, %v1557_v0  ;;  %1407 = vmatpush3.msk.msra.mxu0 %vm755_vm3, %v1009_v52 }
 0x3a9   : > { %v979_v53 = vpop.f32.mrb[6].mxu1 }
 0x3aa   : > { %v1405_v54 = vpop.f32.mrb[7].mxu1 }
 0x3ae   : > { %v902_v55 = vpop.f32.mrb[8].mxu0 }
 0x3af   : > { %v906_v56 = vmul.f32 1.442695, %v902_v55  ;;  %v1398_v57 = vpop.f32.mrb[9].mxu0 }
 0x3b1   : > { %1469 = vpow2.f32 %v906_v56 }
 0x3bb   : > { %v1470_v59 = vpop.eup %1469 }
 0x3bc   : > { %v909_v60 = vmul.f32 %v1470_v59, %v908_v58 }
 0x3be   : > { %v980_v61 = vadd.f32 %v979_v53, %v909_v60 }
 0x3c0   : > { %1409 = vmatmul.mubr.msk.f32.vlgmr.msra.gmra.mrb[10].mxu0 %vm751_vm4, %v980_v61  ;;  %1471 = vtanh.f32 %v980_v61  ;;  %v984_v62 = vmul.f32 -2.0, %v980_v61  ;;  %v983_v15 = vsub.f32 0.6931472, %v980_v61 }
 0x3c2   : > { %v986_v63 = vsub.f32 0.0, %v984_v62  ;;  %v985_v12 = vmax.f32 %v984_v62, 0.0 }
 0x3c4   : > { %v989_v0 = vand.u32 2147483647, %v986_v63  ;;  %vm987_vm6 = vcmp.ne.f32.partialorder %v986_v63, %v986_v63 }
 0x3c6   : > { %v990_v1 = vsub.f32 0.0, %v989_v0 }
 0x3c8   : > { %v991_v2 = vmul.f32 1.442695, %v990_v1 }
 0x3ca   : > { %v1472_v3 = vpop.eup %1471  ;;  %1473 = vpow2.f32 %v991_v2 }
 0x3cb   : > { %1185 = vst.msk [vmem:[%s529_s30] sm:$0xff] %vm751_vm4, %v1472_v3 }
 0x3d4   : > { %v1474_v4 = vpop.eup %1473 }
 0x3d5   : > { %v993_v5 = vadd.f32 1.0, %v1474_v4  ;;  %v996_v6 = vmul.f32 -0.5, %v1474_v4  ;;  %v999_v8 = vand.u32 2147483647, %v1474_v4 }
 0x3d7   : > { %1475 = vlog2.f32 %v993_v5  ;;  %v997_v7 = vadd.f32 1.0, %v996_v6  ;;  %vm1000_vm5 = vcmp.lt.f32.partialorder %v999_v8, 0.0004427343 }
 0x3d8   : > { %1477 = vpow2.f32 %v1087_v24 }
 0x3d9   : > { %v998_v11 = vmul.f32 %v1474_v4, %v997_v7 }
 0x3e1   : > { %v1476_v9 = vpop.eup %1475 }
 0x3e2   : > { %v995_v10 = vmul.f32 0.6931472, %v1476_v9  ;;  %v1478_v28 = vpop.eup %1477 }
 0x3e4   : > { %v1001_v13 = vsel %vm1000_vm5, %v998_v11, %v995_v10 }
 0x3e5   : > { %v1002_v14 = vadd.f32 %v1001_v13, %v985_v12 }
 0x3e7   : > { %v1003_v16 = vsel %vm987_vm6, %v984_v62, %v1002_v14 }
 0x3e8   : > { %v1004_v17 = vsub.f32 %v983_v15, %v1003_v16 }
 0x3ea   : > { %v1005_v18 = vmul.f32 2.0, %v1004_v17 }
 0x3ec   : > { %v1006_v19 = vsel %vm751_vm4, %v1005_v18, 0.0 }
 0x3ed   : > { %1007 = vadd.xlane.f32.xlu1 %v1006_v19 }
 0x47a   : > { %v1008_v46 = vpop.xlane.xlu1 %1007 }
 0x493   : > { %v1082_v25 = vpop.f32.mrb[10].mxu0 }
 0x494   : > { %v1089_v26 = vsub.f32 %v1082_v25, %v1784_v43  ;;  %v1410_v27 = vpop.f32.mrb[11].mxu0 }
 0x496   : > { %v1090_v29 = vmul.f32 %v1478_v28, %v1089_v26 }
 0x498   : > { %v1091_v30 = vmul.f32 -0.5, %v1090_v29 }
 0x49a   : > { %v1092_v31 = vmul.f32 %v1091_v30, %v1090_v29 }
 0x49c   : > { %v1093_v32 = vsub.f32 %v1092_v31, %v1788_v50 }
 0x49e   : > { %1416 = vmatmul.mubr.msk.f32.vlgmr.msra.gmra.mrb[8].mxu1 %vm552_vm1, %v1093_v32 }
 0x571   : > { %v1165_v33 = vpop.f32.mrb[8].mxu1 }
 0x572   : > { %v1351_v34 = vadd.f32 -3.675754, %v1165_v33  ;;  %v1417_v35 = vpop.f32.mrb[9].mxu1 }
 0x574   : > { %v1170_v36 = vsel %vm751_vm4, %v1351_v34, -inf }
 0x575   : > { %1171 = vmax.xlane.f32.xlu0 %v1170_v36 }
 0x602   : > { %v1172_v37 = vpop.xlane.xlu0 %1171 }
 0x603   : > { %v1173_v38 = vsub.f32 %v1351_v34, %v1172_v37 }
 0x605   : > { %v1174_v39 = vmul.f32 1.442695, %v1173_v38 }
 0x607   : > { %1479 = vpow2.f32 %v1174_v39 }
 0x611   : > { %v1480_v40 = vpop.eup %1479 }
 0x612   : > { %v1176_v41 = vsel %vm751_vm4, %v1480_v40, 0.0 }
 0x613   : > { %1177 = vadd.xlane.f32.xlu0 %v1176_v41 }
 0x6a0   : > { %v1178_v42 = vpop.xlane.xlu0 %1177 }
 0x6a1   : > { %1481 = vlog2.f32 %v1178_v42 }
 0x6ab   : > { %v1482_v43 = vpop.eup %1481 }
 0x6ac   : > { %v1180_v44 = vmul.f32 0.6931472, %v1482_v43 }
 0x6ae   : > { %v1181_v45 = vadd.f32 %v1180_v44, %v1172_v37 }
 0x6b0   : > { %v1182_v47 = vsub.f32 %v1181_v45, %v1008_v46 }
 0x6b2   : > { %v1352_v48 = vadd.f32 -1.3862944, %v1182_v47 }
 0x6b4   : > { %1187 = vst.msk [vmem:[%s533_s19] sm:$0xff] %vm1186_vm7, %v1352_v48 }
 0x6b5 PF: > { %s27_s29 = sadd.s32 1, %s1553_s29  }
 0x6b6   : > { %p24_p5 = scmp.ge.s32.totalorder %s27_s29, 4  }
 0x6b8   :  { %26 = sbr.rel (!%p24_p5) target bundleno = 2 (0x2), region = 129 }
 0x6bf   :  { %1221 = vsyncpa [#allocation3], 1 }
 0x6c0   :  { %1223 = vsyncpa [#allocation3 + $0x1], 1 }
 0x6c1   :  { %1224 = vsyncpa [#allocation5], 1 }

</bundles_post_ra>
